<compile_context>
chip_gen: v5e
topology: v5e:2x2
jax: 0.10.0
libtpu: 0.0.40
codegen_flags: <defaults>
</compile_context>

<pallas_src>
import math

import jax
import jax.numpy as jnp
from jax.experimental import pallas as pl
from jax.experimental.pallas import tpu as pltpu

_INV_SQRT2 = 0.7071067811865476


# --------------------------------------------------------------------------
# Kernel
# --------------------------------------------------------------------------
def _make_ffn_expert_kernel(n_inner: int, tti: int):
    """Returns a kernel with a static inner loop over `n_inner` token sub-tiles
    of `tti` rows each (weight tile reused across all of them)."""

    def kernel(x_ref, w1_ref, b1_ref, w2_ref, b2_ref, o_ref, acc_ref):
        # x_ref : (1, TT, H)   w1_ref: (1, H, TF)   b1_ref: (1, 1, TF)
        # w2_ref: (1, TF, H)   b2_ref: (1, 1, H)    o_ref : (1, TT, H)
        # acc_ref: (TT, H) f32 scratch, persists across the (innermost) F axis.
        f = pl.program_id(2)
        n_f = pl.num_programs(2)

        @pl.when(f == 0)
        def _init():
            # Fold b2 into the accumulator initialization.
            acc_ref[...] = jnp.broadcast_to(
                b2_ref[0].astype(jnp.float32), acc_ref.shape)

        w1 = w1_ref[0]                                   # (H, TF)
        w2 = w2_ref[0]                                   # (TF, H)
        b1 = b1_ref[0].astype(jnp.float32)               # (1, TF)
        inv_sqrt2 = jnp.float32(_INV_SQRT2)

        # Static unroll: n_inner is a small Python int (<= 4 in practice).
        for k in range(n_inner):
            if n_inner == 1:
                xs = x_ref[0]                            # (TT, H)
            else:
                xs = x_ref[0, pl.ds(k * tti, tti), :]    # (TTI, H)

            h1 = jnp.dot(xs, w1, preferred_element_type=jnp.float32) + b1
            # Exact GELU (torch.nn.GELU default, erf-based), in f32.
            act = 0.5 * h1 * (1.0 + jax.lax.erf(h1 * inv_sqrt2))
            contrib = jnp.dot(act.astype(w2.dtype), w2,
                              preferred_element_type=jnp.float32)
            if n_inner == 1:
                acc_ref[...] += contrib
            else:
                acc_ref[pl.ds(k * tti, tti), :] += contrib

        @pl.when(f == n_f - 1)
        def _store():
            o_ref[0] = acc_ref[...].astype(o_ref.dtype)

    return kernel


# --------------------------------------------------------------------------
# Generation-aware tile selection
# --------------------------------------------------------------------------
def _tpu_vmem_capacity_bytes():
    """Physical VMEM per core; conservative 64 MiB fallback (v7x-sized)."""
    try:
        info = pltpu.get_tpu_info()
        cap = getattr(info, "vmem_capacity_bytes", None)
        if cap:
            return int(cap)
    except Exception:
        pass
    return 64 << 20


def _aligned_divisors(n, align, cap=None):
    """Multiples of `align` that divide n, descending, optionally capped."""
    hi = n if cap is None else min(n, cap)
    return [t for t in range(align, hi + 1, align) if n % t == 0][::-1]


def _vmem_estimate(tt, tti, tf, H, itemsize):
    """Per-step VMEM footprint, including the (TTI, TF) f32 intermediates."""
    dbl = 2  # BlockSpec double-buffering
    return int(
        dbl * tt * H * itemsize          # x tile
        + dbl * H * tf * itemsize        # w1 tile
        + dbl * tf * 4                   # b1 tile (f32)
        + dbl * tf * H * itemsize        # w2 tile
        + dbl * H * 4                    # b2 tile (f32)
        + dbl * tt * H * itemsize        # out tile
        + tt * H * 4                     # f32 accumulator scratch
        + 2.5 * tti * tf * 4)            # h1 / act f32 + bf16 cast copy


def _choose_tiles(T, H, F, itemsize, vmem_cap):
    """Jointly pick (TT, TTI, TF) so the working set fits the VMEM budget."""
    budget = vmem_cap - max(8 << 20, vmem_cap // 8)     # compiler headroom

    # Bigger VMEM -> push the effective token tile toward the HBM ridge.
    if vmem_cap >= (96 << 20):       # v5e / v6e: 128 MiB VMEM
        tt_cap = 1024
    elif vmem_cap >= (48 << 20):     # v7x: 64 MiB VMEM
        tt_cap = 512
    else:
        tt_cap = 256
    tti_cap = 256                    # bounds the (TTI, TF) f32 intermediates

    # Token-tile candidates (effective tile; 256-aligned preferred).
    if T <= tt_cap:
        tt_cands = [T]
    else:
        tt_cands = (_aligned_divisors(T, 256, tt_cap)
                    or _aligned_divisors(T, 128, tt_cap)
                    or _aligned_divisors(T, 8, tt_cap)
                    or [T])  # TODO(synk): ragged T > cap streams as one tile

    # d_ff tile: last dim of the w1/b1 blocks -> multiple of 128 or full F.
    tf_cands = (_aligned_divisors(F, 256, min(F, 2048))
                or _aligned_divisors(F, 128, min(F, 2048))
                or [F])

    def pick_tti(tt):
        if tt <= tti_cap:
            return tt
        cands = (_aligned_divisors(tt, 256, tti_cap)
                 or _aligned_divisors(tt, 128, tti_cap)
                 or _aligned_divisors(tt, 8, tti_cap)
                 or [tt])
        return cands[0]

    for tt in tt_cands:
        tti = pick_tti(tt)
        for tf in tf_cands:
            if _vmem_estimate(tt, tti, tf, H, itemsize) <= budget:
                return tt, tti, tf
    tt = tt_cands[-1]
    return tt, pick_tti(tt), tf_cands[-1]


# --------------------------------------------------------------------------
# Wrappers
# --------------------------------------------------------------------------
def ffn_experts_forward_expert_major(x, w1, b1, w2, b2, *, f_tile=None,
                                     t_tile=None, inner_t_tile=None,
                                     compute_dtype=jnp.bfloat16):
    """Expert-major FFN: x (E, T, H) -> (E, T, H). No wrapper transposes.

    compute_dtype=bfloat16 (default) streams weights/activations narrow and
    feeds the MXU its native dtype; accumulation and the GELU are always f32.
    NOTE: store the params in `compute_dtype` up front in production — the
    per-call cast below is a full-tensor HBM round trip.
    """
    out_dtype = x.dtype
    cd = jnp.dtype(compute_dtype) if compute_dtype is not None else x.dtype
    if x.dtype != cd:
        x = x.astype(cd)
    if w1.dtype != cd:
        w1 = w1.astype(cd)
    if w2.dtype != cd:
        w2 = w2.astype(cd)
    # b1/b2 are tiny and are consumed in f32 inside the kernel; leave as-is.

    E, T, H = x.shape
    F = w1.shape[-1]
    itemsize = jnp.dtype(cd).itemsize
    vmem_cap = _tpu_vmem_capacity_bytes()

    TT, TTI, TF = _choose_tiles(T, H, F, itemsize, vmem_cap)
    if t_tile is not None:
        TT = t_tile
        TTI = t_tile if inner_t_tile is None else inner_t_tile
    if inner_t_tile is not None:
        TTI = inner_t_tile
    if f_tile is not None:
        TF = f_tile
    assert T % TT == 0 and F % TF == 0 and TT % TTI == 0, \
        "tiles must divide T / F and inner tile must divide the token tile"
    n_t = T // TT
    n_f = F // TF
    n_inner = TT // TTI

    est = _vmem_estimate(TT, TTI, TF, H, itemsize)
    budget = vmem_cap - max(8 << 20, vmem_cap // 8)
    vmem_limit = int(min(max(budget, int(1.25 * est), 32 << 20), vmem_cap))

    kernel = _make_ffn_expert_kernel(n_inner, TTI)

    out = pl.pallas_call(
        kernel,
        out_shape=jax.ShapeDtypeStruct((E, T, H), out_dtype),
        grid_spec=pltpu.PrefetchScalarGridSpec(
            num_scalar_prefetch=0,
            grid=(E, n_t, n_f),                       # reduction (F) axis last
            in_specs=[
                pl.BlockSpec((1, TT, H), lambda e, t, f: (e, t, 0)),   # x
                pl.BlockSpec((1, H, TF), lambda e, t, f: (e, 0, f)),   # w1
                pl.BlockSpec((1, 1, TF), lambda e, t, f: (e, 0, f)),   # b1
                pl.BlockSpec((1, TF, H), lambda e, t, f: (e, f, 0)),   # w2
                pl.BlockSpec((1, 1, H),  lambda e, t, f: (e, 0, 0)),   # b2
            ],
            out_specs=pl.BlockSpec((1, TT, H), lambda e, t, f: (e, t, 0)),
            scratch_shapes=[pltpu.VMEM((TT, H), jnp.float32)],
        ),
        compiler_params=pltpu.CompilerParams(
            # Expert axis first -> megacore split lands on E; weight streams
            # stay disjoint across the two v7x TensorCores.
            dimension_semantics=("parallel", "parallel", "arbitrary"),
            vmem_limit_bytes=vmem_limit,
        ),
    )(x, w1, b1, w2, b2)
    return out


def ffn_experts_forward(inputs, w1, b1, w2, b2, **kw):
    """Torch-parity entry point: inputs (T, E, H) -> out (T, E, H).

    The two transposes here exist only for parity with the PyTorch module.
    In a real MoE stack, call `ffn_experts_forward_expert_major` directly on
    expert-major tokens (fuse the permute into the router scatter/gather).
    """
    x = jnp.transpose(inputs, (1, 0, 2))              # (E, T, H)
    out = ffn_experts_forward_expert_major(x, w1, b1, w2, b2, **kw)
    return jnp.transpose(out, (1, 0, 2))              # (T, E, H)


def init_params(key, num_experts, d_model, d_ff, dtype=jnp.float32):
    """Deterministic truncated-normal init mirroring the PyTorch __init__."""
    s1 = math.sqrt(0.1 / d_model)
    s2 = math.sqrt(0.1 / d_ff)
    k1, k2, k3, k4 = jax.random.split(key, 4)
    # trunc_normal_ in torch truncates at +/- 2 std
    tn = lambda k, shape, std: (
        jax.random.truncated_normal(k, -2.0, 2.0, shape, dtype) * std)
    w1 = tn(k1, (num_experts, d_model, d_ff), s1)
    b1 = tn(k2, (num_experts, 1, d_ff), s1)
    w2 = tn(k3, (num_experts, d_ff, d_model), s2)
    b2 = tn(k4, (num_experts, 1, d_model), s2)
    return w1, b1, w2, b2


if __name__ == "__main__":
    # Small, module-consistent shapes.
    num_experts = 2       # num_local_experts (E)
    d_model = 32          # H
    d_ff = 64             # F
    tokens = 8            # T (tokens routed per expert slot)
    # drop_rate defaults to 0 -> dropout is identity (inference semantics).

    key = jax.random.PRNGKey(0)
    k_x, k_p = jax.random.split(key)

    x = jax.random.normal(k_x, (tokens, num_experts, d_model), dtype=jnp.float32)
    w1, b1, w2, b2 = init_params(k_p, num_experts, d_model, d_ff)

    # Pure-JAX reference (f32, highest precision).
    hi = jax.lax.Precision.HIGHEST
    x_e = jnp.transpose(x, (1, 0, 2))                               # (E, T, H)
    h1 = jnp.einsum("eth,ehf->etf", x_e, w1, precision=hi) + b1
    act = 0.5 * h1 * (1.0 + jax.lax.erf(h1 / jnp.sqrt(2.0)))
    ref = jnp.einsum("etf,efh->eth", act, w2, precision=hi) + b2
    ref = jnp.transpose(ref, (1, 0, 2))

    # 1) Exact-parity path: f32 matmuls, tight tolerance.
    out_f32 = jax.block_until_ready(
        ffn_experts_forward(x, w1, b1, w2, b2, compute_dtype=jnp.float32))
    assert out_f32.shape == x.shape
    assert jnp.allclose(out_f32, ref, atol=1e-4, rtol=1e-4)

    # 2) Default fast path: bf16 matmuls with f32 accumulation (the documented
    #    precision trade-off) -> looser tolerance against the f32 reference.
    out_bf16 = jax.block_until_ready(ffn_experts_forward(x, w1, b1, w2, b2))
    assert out_bf16.shape == x.shape
    assert out_bf16.dtype == x.dtype
    assert jnp.allclose(out_bf16, ref, atol=3e-2, rtol=3e-2)

    print("KERNEL_OK")
</pallas_src>

<mosaic_0001>
module attributes {stable_mosaic.version = 11 : i64} {
  func.func @kernel(%arg0: i32, %arg1: i32, %arg2: i32, %arg3: memref<1x8x32xf32, #tpu.memory_space<vmem>>, %arg4: memref<1x32x64xf32, #tpu.memory_space<vmem>>, %arg5: memref<1x1x64xf32, #tpu.memory_space<vmem>>, %arg6: memref<1x64x32xf32, #tpu.memory_space<vmem>>, %arg7: memref<1x1x32xf32, #tpu.memory_space<vmem>>, %arg8: memref<1x8x32xf32, #tpu.memory_space<vmem>>, %arg9: memref<8x32xf32, #tpu.memory_space<vmem>>) attributes {dimension_semantics = [#tpu.dimension_semantics<parallel>, #tpu.dimension_semantics<parallel>, #tpu.dimension_semantics<arbitrary>], iteration_bounds = array<i64: 2, 1, 1>, scalar_prefetch = 0 : i64, scratch_operands = 1 : i64, tpu.core_type = #tpu.core_type<tc>, window_params = [{transform_indices = @transform_0, window_bounds = array<i64: 1, 8, 32>}, {transform_indices = @transform_1, window_bounds = array<i64: 1, 32, 64>}, {transform_indices = @transform_2, window_bounds = array<i64: 1, 1, 64>}, {transform_indices = @transform_3, window_bounds = array<i64: 1, 64, 32>}, {transform_indices = @transform_4, window_bounds = array<i64: 1, 1, 32>}, {transform_indices = @transform_5, window_bounds = array<i64: 1, 8, 32>}]} {
    %c0_i32 = arith.constant 0 : i32
    %0 = arith.cmpi eq, %arg2, %c0_i32 : i32
    %1 = arith.extui %0 : i1 to i32
    %c0_i32_0 = arith.constant 0 : i32
    %2 = arith.cmpi ne, %1, %c0_i32_0 : i32
    scf.if %2 {
      %c0_22 = arith.constant 0 : index
      %c0_23 = arith.constant 0 : index
      %c0_24 = arith.constant 0 : index
      %29 = vector.load %arg7[%c0_22, %c0_23, %c0_24] : memref<1x1x32xf32, #tpu.memory_space<vmem>>, vector<1x1x32xf32>
      %30 = vector.shape_cast %29 : vector<1x1x32xf32> to vector<1x32xf32>
      %31 = vector.shape_cast %30 : vector<1x32xf32> to vector<1x32xf32>
      %32 = vector.broadcast %31 : vector<1x32xf32> to vector<8x32xf32>
      %c0_25 = arith.constant 0 : index
      %c0_26 = arith.constant 0 : index
      %33 = vector.load %arg9[%c0_25, %c0_26] : memref<8x32xf32, #tpu.memory_space<vmem>>, vector<8x32xf32>
      tpu.vector_store %arg9[%c0_25, %c0_26], %32 {strides = array<i32>} : memref<8x32xf32, #tpu.memory_space<vmem>>, vector<8x32xf32>,
    } else {
    }
    %c0 = arith.constant 0 : index
    %c0_1 = arith.constant 0 : index
    %c0_2 = arith.constant 0 : index
    %3 = vector.load %arg4[%c0, %c0_1, %c0_2] : memref<1x32x64xf32, #tpu.memory_space<vmem>>, vector<1x32x64xf32>
    %4 = vector.shape_cast %3 : vector<1x32x64xf32> to vector<32x64xf32>
    %c0_3 = arith.constant 0 : index
    %c0_4 = arith.constant 0 : index
    %c0_5 = arith.constant 0 : index
    %5 = vector.load %arg6[%c0_3, %c0_4, %c0_5] : memref<1x64x32xf32, #tpu.memory_space<vmem>>, vector<1x64x32xf32>
    %6 = vector.shape_cast %5 : vector<1x64x32xf32> to vector<64x32xf32>
    %c0_6 = arith.constant 0 : index
    %c0_7 = arith.constant 0 : index
    %c0_8 = arith.constant 0 : index
    %7 = vector.load %arg5[%c0_6, %c0_7, %c0_8] : memref<1x1x64xf32, #tpu.memory_space<vmem>>, vector<1x1x64xf32>
    %8 = vector.shape_cast %7 : vector<1x1x64xf32> to vector<1x64xf32>
    %c0_9 = arith.constant 0 : index
    %c0_10 = arith.constant 0 : index
    %c0_11 = arith.constant 0 : index
    %9 = vector.load %arg3[%c0_9, %c0_10, %c0_11] : memref<1x8x32xf32, #tpu.memory_space<vmem>>, vector<1x8x32xf32>
    %10 = vector.shape_cast %9 : vector<1x8x32xf32> to vector<8x32xf32>
    %cst = arith.constant dense<0.000000e+00> : vector<8x64xf32>
    %11 = tpu.matmul %10, %4, %cst {dimension_numbers = #tpu.dot_dimension_numbers<[1], [0], [0], [1], [0, 0, 1, 1], [], []>} : vector<8x32xf32>, vector<32x64xf32>, vector<8x64xf32> -> vector<8x64xf32>
    %12 = vector.broadcast %8 : vector<1x64xf32> to vector<8x64xf32>
    %13 = arith.addf %11, %12 : vector<8x64xf32>
    %cst_12 = arith.constant 5.000000e-01 : f32
    %14 = vector.broadcast %cst_12 : f32 to vector<8x64xf32>
    %15 = arith.mulf %14, %13 : vector<8x64xf32>
    %cst_13 = arith.constant 0.707106769 : f32
    %16 = vector.broadcast %cst_13 : f32 to vector<8x64xf32>
    %17 = arith.mulf %13, %16 : vector<8x64xf32>
    %18 = math.erf %17 : vector<8x64xf32>
    %cst_14 = arith.constant 1.000000e+00 : f32
    %19 = vector.broadcast %cst_14 : f32 to vector<8x64xf32>
    %20 = arith.addf %19, %18 : vector<8x64xf32>
    %21 = arith.mulf %15, %20 : vector<8x64xf32>
    %cst_15 = arith.constant dense<0.000000e+00> : vector<8x32xf32>
    %22 = tpu.matmul %21, %6, %cst_15 {dimension_numbers = #tpu.dot_dimension_numbers<[1], [0], [0], [1], [0, 0, 1, 1], [], []>} : vector<8x64xf32>, vector<64x32xf32>, vector<8x32xf32> -> vector<8x32xf32>
    %c0_16 = arith.constant 0 : index
    %c0_17 = arith.constant 0 : index
    %23 = vector.load %arg9[%c0_16, %c0_17] : memref<8x32xf32, #tpu.memory_space<vmem>>, vector<8x32xf32>
    %24 = arith.addf %23, %22 : vector<8x32xf32>
    %c0_18 = arith.constant 0 : index
    %c0_19 = arith.constant 0 : index
    %25 = vector.load %arg9[%c0_18, %c0_19] : memref<8x32xf32, #tpu.memory_space<vmem>>, vector<8x32xf32>
    tpu.vector_store %arg9[%c0_18, %c0_19], %24 {strides = array<i32>} : memref<8x32xf32, #tpu.memory_space<vmem>>, vector<8x32xf32>,
    %c0_i32_20 = arith.constant 0 : i32
    %26 = arith.cmpi eq, %arg2, %c0_i32_20 : i32
    %27 = arith.extui %26 : i1 to i32
    %c0_i32_21 = arith.constant 0 : i32
    %28 = arith.cmpi ne, %27, %c0_i32_21 : i32
    scf.if %28 {
      %c0_22 = arith.constant 0 : index
      %c0_23 = arith.constant 0 : index
      %29 = vector.load %arg9[%c0_22, %c0_23] : memref<8x32xf32, #tpu.memory_space<vmem>>, vector<8x32xf32>
      %c0_24 = arith.constant 0 : index
      %c0_25 = arith.constant 0 : index
      %c0_26 = arith.constant 0 : index
      %30 = vector.load %arg8[%c0_24, %c0_25, %c0_26] : memref<1x8x32xf32, #tpu.memory_space<vmem>>, vector<1x8x32xf32>
      %31 = vector.shape_cast %30 : vector<1x8x32xf32> to vector<8x32xf32>
      %32 = vector.shape_cast %29 : vector<8x32xf32> to vector<1x8x32xf32>
      tpu.vector_store %arg8[%c0_24, %c0_25, %c0_26], %32 {strides = array<i32>} : memref<1x8x32xf32, #tpu.memory_space<vmem>>, vector<1x8x32xf32>,
    } else {
    }
    return
  }
  func.func @transform_0(%arg0: i32, %arg1: i32, %arg2: i32) -> (i32, i32, i32) {
    %c0_i32 = arith.constant 0 : i32
    %c0_i32_0 = arith.constant 0 : i32
    return %arg0, %arg1, %c0_i32 : i32, i32, i32
  }
  func.func @transform_1(%arg0: i32, %arg1: i32, %arg2: i32) -> (i32, i32, i32) {
    %c0_i32 = arith.constant 0 : i32
    %c0_i32_0 = arith.constant 0 : i32
    return %arg0, %c0_i32, %arg2 : i32, i32, i32
  }
  func.func @transform_2(%arg0: i32, %arg1: i32, %arg2: i32) -> (i32, i32, i32) {
    %c0_i32 = arith.constant 0 : i32
    %c0_i32_0 = arith.constant 0 : i32
    return %arg0, %c0_i32, %arg2 : i32, i32, i32
  }
  func.func @transform_3(%arg0: i32, %arg1: i32, %arg2: i32) -> (i32, i32, i32) {
    %c0_i32 = arith.constant 0 : i32
    %c0_i32_0 = arith.constant 0 : i32
    return %arg0, %arg2, %c0_i32 : i32, i32, i32
  }
  func.func @transform_4(%arg0: i32, %arg1: i32, %arg2: i32) -> (i32, i32, i32) {
    %c0_i32 = arith.constant 0 : i32
    %c0_i32_0 = arith.constant 0 : i32
    %c0_i32_1 = arith.constant 0 : i32
    return %arg0, %c0_i32, %c0_i32_0 : i32, i32, i32
  }
  func.func @transform_5(%arg0: i32, %arg1: i32, %arg2: i32) -> (i32, i32, i32) {
    %c0_i32 = arith.constant 0 : i32
    %c0_i32_0 = arith.constant 0 : i32
    return %arg0, %arg1, %c0_i32 : i32, i32, i32
  }
}

</mosaic_0001>

<bundles_post_ra>
// kernel: tpu_custom_call.1
= control target key start
LH: loop header
LB: loop body
LE: loop exit
PB: predicated region body
PF: predicated region fallthrough
CT: control target
= control target key end

     0   :  { %10 = vsyncpa [#allocation4], 0  ;;  %s935_s0 = inlined_call_operand.vmem [shape: f32[2,8,32], index: 0, kind: input, shape index: {}]   ;;  %s936_s1 = inlined_call_operand.vmem [shape: f32[2,32,64], index: 1, kind: input, shape index: {}]   ;;  %s937_s2 = inlined_call_operand.vmem [shape: f32[2,1,64], index: 2, kind: input, shape index: {}]   ;;  %s938_s3 = inlined_call_operand.vmem [shape: f32[2,64,32], index: 3, kind: input, shape index: {}]   ;;  %s939_s4 = inlined_call_operand.vmem [shape: f32[2,1,32], index: 4, kind: input, shape index: {}]   ;;  %s940_s5 = inlined_call_operand.hbm [shape: f32[2,8,32], index: 5, kind: output, shape index: {}]  }
   0x1   :  { %12 = vsyncpa [#allocation4 + $0x1], 0  ;;  %s822_s18 = smov 0   ;;  %s824_s19 = smov 0  }
   0x2   :  { %s826_s20 = smov 0   ;;  %s828_s21 = smov 0  }
   0x3   :  { %s830_s22 = smov 0   ;;  %s832_s23 = smov 0  }
   0x4 LB: > { %s633_s24 = sadd.s32 4294967295, %s790_s23   ;;  %s634_s25 = sadd.s32 4294967294, %s790_s23   ;;  %s790_s23 = sphi %s832_s23, %s18_s23   ;;  %s786_s22 = sphi %s830_s22, %s947_s22   ;;  %s782_s21 = sphi %s828_s21, %s946_s21   ;;  %s778_s20 = sphi %s826_s20, %s945_s20   ;;  %s774_s19 = sphi %s824_s19, %s944_s19   ;;  %s770_s18 = sphi %s822_s18, %s943_s18  }
   0x5   : > { %s37_s26 = sadd.s32 1, %s786_s22  ;;  %s184_s27 = sadd.s32 1, %s778_s20 }
   0x6   : > { %p39_p0 = scmp.ge.s32.totalorder %s37_s26, 2  ;;  %p194_p1 = scmp.ne.s32.totalorder %s778_s20, %s774_s19 }
   0x7   : > { %p195_p2 = scmp.eq.s32.totalorder %s633_s24, 1  ;;  %p200_p3 = scmp.ne.s32.totalorder %s774_s19, %s770_s18 }
   0x8   : > { %s949_s26 = smov (%p39_p0, %s37_s26), 0  ;;  %p201_p5 = scmp.eq.s32.totalorder %s634_s25, 1 }
   0x9   : > { %p862_p4 = por %p195_p2, %p194_p1  ;;  %s179_s29 = ssub.s32 %s786_s22, %s949_s26 }
   0xa   : > { %p637_p6 = scmp.ge.s32.totalorder %s790_s23, 1  ;;  %p182_p7 = scmp.eq.s32.totalorder %s179_s29, 0 }
   0xb   : > { %p869_p8 = por %p201_p5, %p200_p3  ;;  %p268_p9 = scmp.lt.s32.totalorder %s790_s23, 3 }
   0xc   : > { %s875_s6 = scalar_select %p182_p7, %s778_s20, %s184_s27  }
   0xd   : > { %p269_p10 = pnand %p637_p6, %p268_p9 }
   0xe   : > { %p324_p11 = scmp.lt.s32.totalorder (!%p269_p10), %s782_s21, 1  ;;  %s732_s10 = scalar_lea.hbm (!%p269_p10), %s940_s5, 16 }
   0xf   : > { %272 = sbr.rel (%p269_p10) target bundleno = 350 (0x15e), region = 40 }
  0x14   : > { %s325_s7 = scalar_select %p324_p11, %s782_s21, 1  ;;  %vm366_vm0 = vcmask 261120   ;;  %vm453_vm5 = vcmask 523264  }
  0x16   : > { %s651_s8 = sshll.u32 %s325_s7, 5  ;;  %s639_s12 = sshll.u32 %s325_s7, 3 }
  0x17   : > { %s338_s11 = scalar_lea.vmem %s936_s1, %s651_s8  ;;  %s357_s15 = scalar_lea.vmem %s939_s4, %s325_s7 }
  0x18   : > { %v371_v0 = vld [vmem:[%s338_s11 + $0x18] sm:$0xff]  ;;  %v370_v1 = vld [vmem:[%s338_s11 + $0x10] sm:$0xff]  ;;  %v708_v2 = vld [vmem:[%s357_s15] ss:$0 sm:$0xff]  ;;  %s344_s24 = scalar_lea.vmem %s937_s2, %s325_s7  ;;  %s330_s29 = scalar_lea.vmem %s935_s0, %s639_s12 }
  0x19   : > { %401 = vmatpush.msra.mxu0 %v371_v0  ;;  %v369_v3 = vld [vmem:[%s338_s11 + $0x8] sm:$0xff]  ;;  %367 = vst.msk [vmem:[#allocation2] sm:$0xff] %vm366_vm0, %v708_v2  ;;  %v368_v4 = vld [vmem:[%s338_s11] sm:$0xff]  ;;  %s652_s8 = sshll.u32 %s325_s7, 6  ;;  %s321_s7 = sand.u32 1, %s774_s19  }
  0x1a   : > { %v381_v5 = vld [vmem:[%s330_s29] sm:$0xff]  ;;  %s353_s13 = scalar_lea.vmem %s938_s3, %s652_s8  ;;  %s638_s11 = sshll.u32 %s321_s7, 3 }
  0x1b   : > { %402 = vmatpush.msra.mxu0 %v370_v1  ;;  %v709_v6 = vld [vmem:[%s344_s24] ss:$0 sm:$0xff]  ;;  %v379_v12 = vld [vmem:[%s353_s13 + $0x38] sm:$0xff]  ;;  %v378_v15 = vld [vmem:[%s353_s13 + $0x30] sm:$0xff]  ;;  %s648_s12 = sshll.u32 %s782_s21, 3  ;;  %s323_s17 = scalar_lea.vmem [#allocation3], %s638_s11 }
  0x1c   : > { %465 = vmatpush.msra.mxu1 %v379_v12  ;;  %v377_v18 = vld [vmem:[%s353_s13 + $0x28] sm:$0xff]  ;;  %v376_v21 = vld [vmem:[%s353_s13 + $0x20] sm:$0xff]  ;;  %v375_v22 = vld [vmem:[%s353_s13 + $0x18] sm:$0xff]  ;;  %s497_s16 = scalar_lea.hbm %s940_s5, %s648_s12  ;;  %s499_s24 = sshll.u32 %s323_s17, 4  ;;  %s500_s24 = int_to_ptr.vmem [resolvable:$true] %s499_s24 }
  0x1d   : > { %403 = vmatpush.msra.mxu0 %v369_v3  ;;  %v374_v24 = vld [vmem:[%s353_s13 + $0x10] sm:$0xff]  ;;  %v373_v27 = vld [vmem:[%s353_s13 + $0x8] sm:$0xff]  ;;  %v372_v29 = vld [vmem:[%s353_s13] sm:$0xff]  ;;  %s501_s25 = sshll.u32 %s497_s16, 4  ;;  %s486_s27 = scalar_lea.sflag [#allocation4], %s321_s7  ;;  %s502_s25 = int_to_ptr.hbm [resolvable:$true] %s501_s25 }
  0x1e   : > { %466 = vmatpush.msra.mxu1 %v378_v15  ;;  %s726_s29 = sshra.s32 %s502_s25, 4  ;;  %s727_s29 = int_to_ptr.hbm [resolvable:$true] %s726_s29 }
  0x1f   : > { %404 = vmatpush.msra.mxu0 %v368_v4  ;;  %s728_s21 = scalar_lea.hbm %s727_s29, 8  ;;  %p733_p1 = scmp.lt.s32.totalorder %s727_s29, %s940_s5 }
  0x20   : > { %644 = vmatmul.msk.f32.vlgmr.msra.gmra.mxu0 %vm366_vm0, %v381_v5  ;;  %467 = vmatpush.msra.mxu1 %v377_v18  ;;  %v477_v56 = vld [vmem:[#allocation2] sm:$0xff]  ;;  %p729_p12 = scmp.ne.s32.totalorder %s727_s29, %s728_s21  ;;  %p734_p2 = scmp.lt.s32.totalorder %s732_s10, %s728_s21 }
  0x22   : > { %468 = vmatpush.msra.mxu1 %v376_v21  ;;  %p730_p13 = pnand %p729_p12, %p862_p4  ;;  %p735_p3 = por %p734_p2, %p733_p1 }
  0x24   : > { %469 = vmatpush.msra.mxu1 %v375_v22  ;;  %p731_p0 = pneg %p730_p13 }
  0x26   : > { %470 = vmatpush.msra.mxu1 %v374_v24  ;;  %p736_p5 = pnand %p735_p3, %p731_p0 }
  0x28   : > { %471 = vmatpush.msra.mxu1 %v373_v27 }
  0x2a   : > { %472 = vmatpush.msra.mxu1 %v372_v29 }
  0x9d   : > { %v406_v7 = vpop.f32.mrf.mxu0 }
  0x9e   : > { %v407_v8 = vadd.f32 %v709_v6, %v406_v7 }
  0xa0   : > { %v410_v9 = vmul.f32 0.70710677, %v407_v8  ;;  %v409_v53 = vmul.f32 0.5, %v407_v8 }
  0xa2   : > { %v411_v10 = vmul.f32 %v410_v9, %v410_v9 }
  0xa4   : > { %v412_v11 = vmin.f32 %v411_v10, 16.0 }
  0xa6   : > { %v413_v13 = vmul.f32 2.1237322e-06, %v412_v11  ;;  %v424_v14 = vmul.f32 3.8918573e-05, %v412_v11 }
  0xa8   : > { %v414_v16 = vadd.f32 0.00028619796, %v413_v13  ;;  %v425_v17 = vadd.f32 0.001143296, %v424_v14 }
  0xaa   : > { %v415_v19 = vmul.f32 %v414_v16, %v412_v11  ;;  %v426_v20 = vmul.f32 %v425_v17, %v412_v11 }
  0xac   : > { %v427_v23 = vadd.f32 0.014752088, %v426_v20  ;;  %v416_v25 = vadd.f32 0.0036580483, %v415_v19 }
  0xae   : > { %v428_v26 = vmul.f32 %v427_v23, %v412_v11  ;;  %v417_v30 = vmul.f32 %v416_v25, %v412_v11 }
  0xb0   : > { %v429_v28 = vadd.f32 0.112945676, %v428_v26  ;;  %v418_v33 = vadd.f32 0.05243302, %v417_v30 }
  0xb2   : > { %v430_v31 = vmul.f32 %v429_v28, %v412_v11  ;;  %v419_v36 = vmul.f32 %v418_v33, %v412_v11 }
  0xb4   : > { %v431_v32 = vadd.f32 0.4994258, %v430_v31  ;;  %v420_v37 = vadd.f32 0.18741608, %v419_v36 }
  0xb6   : > { %v432_v34 = vmul.f32 %v431_v32, %v412_v11  ;;  %v421_v39 = vmul.f32 %v420_v37, %v412_v11 }
  0xb8   : > { %v433_v35 = vadd.f32 1.0, %v432_v34  ;;  %v422_v43 = vadd.f32 1.1283791, %v421_v39 }
  0xba   : > { %710 = vrcp.f32 %v433_v35  ;;  %v445_v42 = vand.u32 2147483648, %v433_v35  ;;  %v443_v45 = vand.u32 2147483647, %v433_v35  ;;  %vm439_vm2 = vweird.f32 %v433_v35 }
  0xbb   : > { %v423_v48 = vmul.f32 %v422_v43, %v410_v9 }
  0xbc   : > { %v446_v47 = vor.u32 1.1754944e-38, %v445_v42  ;;  %vm444_vm4 = vcmp.eq.f32.partialorder %v443_v45, 8.507059e+37 }
  0xc0   : > { %v711_v38 = vpop.eup %710 }
  0xc1   : > { %v435_v40 = vmul.f32 %v711_v38, %v433_v35  ;;  %vm440_vm1 = vweird.f32 %v711_v38 }
  0xc2   : > { %vm441_vm3 = vmor %vm439_vm2, %vm440_vm1 }
  0xc3   : > { %v436_v41 = vsub.f32 1.0, %v435_v40 }
  0xc5   : > { %v437_v44 = vmul.f32 %v711_v38, %v436_v41 }
  0xc7   : > { %v438_v46 = vadd.f32 %v711_v38, %v437_v44 }
  0xc9   : > { %v442_v49 = vsel %vm441_vm3, %v711_v38, %v438_v46 }
  0xca   : > { %v447_v50 = vsel %vm444_vm4, %v446_v47, %v442_v49 }
  0xcb   : > { %v448_v51 = vmul.f32 %v447_v50, %v423_v48 }
  0xcd   : > { %v645_v52 = vclamps-f32 %v448_v51, 1.0 }
  0xcf   : > { %v451_v54 = vadd.f32 1.0, %v645_v52 }
  0xd1   : > { %v452_v55 = vmul.f32 %v451_v54, %v409_v53 }
  0xd3   : > { %646 = vmatmul.msk.f32.vlgmr.msra.gmra.mxu1 %vm453_vm5, %v452_v55 }
 0x150   : > { %v474_v57 = vpop.f32.mrf.mxu1 }
 0x151   : > { %v478_v58 = vadd.f32 %v477_v56, %v474_v57 }
 0x153   : > { %479 = vst.msk [vmem:[#allocation2] sm:$0xff] %vm366_vm0, %v478_v58 }
 0x15a   : > { %v483_v59 = vld [vmem:[#allocation2] sm:$0xff] }
 0x15b   : > { %484 = vst.msk [vmem:[%s323_s17] sm:$0xff] %vm366_vm0, %v483_v59 }
 0x15c   : > { %739 = shalt.err (!%p736_p5)
}
 0x15d   : > { %653 = dma.vmem_to_hbm [thread:$0]  (%p862_p4), %s500_s24, 128, %s502_s25, %s486_s27  }
 0x15e PF: > { %p659_p6 = scmp.ge.s32.totalorder %s790_s23, 2  ;;  %s513_s7 = sand.u32 1, %s770_s18  }
 0x15f   : > { %s514_s12 = scalar_lea.sflag [#allocation4], %s513_s7 }
 0x160   : > { %p656_p7 = pnand %p659_p6, %p869_p8 }
 0x162   : > { %p657_p9 = pneg %p656_p7 }
 0x164   : > { %765 = dma.done.wait (%p657_p9), %s514_s12, 128  }
 0x165   : > { %767 = vsyncadd (%p657_p9), %s514_s12, 4294967168  ;;  %s18_s23 = sadd.s32 1, %s790_s23   ;;  %s943_s18 = smov %s774_s19 }
 0x166   : > { %p15_p10 = scmp.ge.s32.totalorder %s18_s23, 4   ;;  %s944_s19 = smov %s778_s20 }
 0x167   : > { %s945_s20 = smov %s875_s6  ;;  %s946_s21 = smov %s786_s22 }
 0x168   : > { %s947_s22 = smov %s949_s26  ;;  %17 = sbr.rel (!%p15_p10) target bundleno = 4 (0x4), region = 95 }
 0x16d   :  { %520 = vsyncpa [#allocation4], 1 }
 0x16e   :  { %522 = vsyncpa [#allocation4 + $0x1], 1 }

</bundles_post_ra>
